<compile_context>
chip_gen: v6e
topology: v6e:2x2x1
jax: 0.10.0
libtpu: 0.0.40
codegen_flags: <defaults>
</compile_context>

<pallas_src>
import jax
import jax.numpy as jnp
from jax.experimental import pallas as pl
from jax.experimental.pallas import tpu as pltpu

_ROW_TILE = 1024  # 1024 rows x 512 lanes x 4 B = 2 MiB per f32 tile


def _scale_kernel(scale_ref, x_ref, o_ref):
    # scale_ref: (1, 1) f32 scalar in SMEM; x_ref / o_ref: (tr, lane) tile in VMEM.
    s = scale_ref[0, 0]
    o_ref[...] = (x_ref[...] * s).astype(o_ref.dtype)


def _pick_lane(n):
    """Largest lane-dense width (multiple of 128) that divides n, else 512 (pad)."""
    for lane in (512, 256, 128):
        if n % lane == 0:
            return lane, False
    return 512, True


def scale_forward(x, scale):
    """x: any-shaped float array (e.g. NCHW); scale: scalar float32 parameter."""
    orig_shape = x.shape
    n = x.size

    # TODO(synk): for tiny tensors (like the 2x4x16x16 test shape) this scalar
    # multiply is better left to XLA fusion in the surrounding jit than a
    # standalone pallas_call; kept as a kernel here per the exercise.

    lane, need_pad = _pick_lane(n)

    # Flatten to a lane-dense 2D slab; pad the tail only when unavoidable
    # (padding costs an extra HBM copy for a purely bandwidth-bound op).
    flat = x.reshape(-1)
    rows = pl.cdiv(n, lane)
    padded = rows * lane
    if need_pad:
        flat = jnp.pad(flat, (0, padded - n))
    x2d = flat.reshape(rows, lane)

    # Row tile: full extent when small (always a legal block shape), otherwise a
    # fixed 8-aligned tile; pl.cdiv grid lets Pallas mask the partial edge block.
    tr = rows if rows <= _ROW_TILE else _ROW_TILE
    grid = (pl.cdiv(rows, tr),)

    # Keep the parameter in f32 (matches PyTorch's fp32 nn.Parameter).
    scale_arr = jnp.asarray(scale, dtype=jnp.float32).reshape(1, 1)

    out2d = pl.pallas_call(
        _scale_kernel,
        out_shape=jax.ShapeDtypeStruct((rows, lane), x.dtype),
        grid_spec=pl.GridSpec(
            grid=grid,
            in_specs=[
                pl.BlockSpec(memory_space=pltpu.SMEM),        # scalar parameter
                pl.BlockSpec((tr, lane), lambda i: (i, 0)),   # lane-dense tile
            ],
            out_specs=pl.BlockSpec((tr, lane), lambda i: (i, 0)),
        ),
        input_output_aliases={1: 0},  # x2d (input 1) -> output 0
        compiler_params=pltpu.CompilerParams(
            dimension_semantics=("parallel",),
        ),
    )(scale_arr, x2d)

    out_flat = out2d.reshape(-1)
    if need_pad:
        out_flat = out_flat[:n]
    return out_flat.reshape(orig_shape)


if __name__ == "__main__":
    key = jax.random.PRNGKey(0)
    x = jax.random.normal(key, (2, 4, 16, 16), dtype=jnp.float32)

    # Deterministic, non-trivial parameter value to exercise the multiply.
    scale_param = jnp.float32(1.5)

    y = scale_forward(x, scale_param)
    y = jax.block_until_ready(y)

    # Reference check against the PyTorch semantics: y = x * scale.
    y_ref = x * scale_param
    assert y.shape == x.shape and y.dtype == x.dtype
    assert jnp.allclose(y, y_ref, rtol=1e-6, atol=1e-6)

    print("KERNEL_OK")
</pallas_src>

<mosaic_0001>
module attributes {stable_mosaic.version = 11 : i64} {
  func.func @_scale_kernel(%arg0: i32, %arg1: memref<1x1xf32, #tpu.memory_space<smem>>, %arg2: memref<4x512xf32, #tpu.memory_space<vmem>>, %arg3: memref<4x512xf32, #tpu.memory_space<vmem>>) attributes {dimension_semantics = [#tpu.dimension_semantics<parallel>], iteration_bounds = array<i64: 1>, scalar_prefetch = 0 : i64, scratch_operands = 0 : i64, tpu.core_type = #tpu.core_type<tc>, window_params = [{transform_indices = @transform_0, window_bounds = array<i64: 1, 1>}, {transform_indices = @transform_1, window_bounds = array<i64: 4, 512>}, {transform_indices = @transform_2, window_bounds = array<i64: 4, 512>}]} {
    %c0 = arith.constant 0 : index
    %c0_0 = arith.constant 0 : index
    %0 = memref.load %arg1[%c0, %c0_0] : memref<1x1xf32, #tpu.memory_space<smem>>
    %c0_1 = arith.constant 0 : index
    %c0_2 = arith.constant 0 : index
    %1 = vector.load %arg2[%c0_1, %c0_2] : memref<4x512xf32, #tpu.memory_space<vmem>>, vector<4x512xf32>
    %2 = vector.broadcast %0 : f32 to vector<4x512xf32>
    %3 = arith.mulf %1, %2 : vector<4x512xf32>
    %c0_3 = arith.constant 0 : index
    %c0_4 = arith.constant 0 : index
    %4 = vector.load %arg3[%c0_3, %c0_4] : memref<4x512xf32, #tpu.memory_space<vmem>>, vector<4x512xf32>
    tpu.vector_store %arg3[%c0_3, %c0_4], %3 {strides = array<i32>} : memref<4x512xf32, #tpu.memory_space<vmem>>, vector<4x512xf32>,
    return
  }
  func.func @transform_0(%arg0: i32) -> (i32, i32) {
    %c0_i32 = arith.constant 0 : i32
    %c0_i32_0 = arith.constant 0 : i32
    %c0_i32_1 = arith.constant 0 : i32
    return %c0_i32, %c0_i32_0 : i32, i32
  }
  func.func @transform_1(%arg0: i32) -> (i32, i32) {
    %c0_i32 = arith.constant 0 : i32
    %c0_i32_0 = arith.constant 0 : i32
    return %arg0, %c0_i32 : i32, i32
  }
  func.func @transform_2(%arg0: i32) -> (i32, i32) {
    %c0_i32 = arith.constant 0 : i32
    %c0_i32_0 = arith.constant 0 : i32
    return %arg0, %c0_i32 : i32, i32
  }
}

</mosaic_0001>

<bundles_post_ra>
// kernel: tpu_custom_call.1
= control target key start
LH: loop header
LB: loop body
LE: loop exit
PB: predicated region body
PF: predicated region fallthrough
CT: control target
= control target key end

     0   :  { %8 = vsyncpa [#allocation4], 0  ;;  %s120_s0 = inlined_call_operand.<no memory space> [shape: f32[1,1], index: 0, kind: input, shape index: {}]   ;;  %s121_s1 = inlined_call_operand.hbm [shape: f32[4,512], index: 1, kind: input, shape index: {}, may-alias: {1,2}]   ;;  %s122_s2 = inlined_call_operand.hbm [shape: f32[4,512], index: 2, kind: output, shape index: {}, may-alias: {1,2}]  }
   0x1   :  { %9 = vsyncpa [#allocation5], 0  ;;  %s94_s9 = smov [#allocation3]  }
   0x2   :  { %s18_s10 = sshll.u32 %s94_s9, 4  ;;  %s19_s10 = int_to_ptr.vmem [resolvable:$true] %s18_s10 }
   0x3   :  { %s58_s11 = scalar_lea.vmem %s19_s10, 256  ;;  %p63_p1 = scmp.lt.s32.totalorder %s19_s10, %s19_s10 }
   0x4   :  { %p59_p0 = scmp.ne.s32.totalorder %s19_s10, %s58_s11  ;;  %p64_p2 = scmp.lt.s32.totalorder %s58_s11, %s58_s11 }
   0x6   :  { %p65_p3 = por %p64_p2, %p63_p1 }
   0x8   :  { %p66_p4 = pnand %p65_p3, %p59_p0 }
   0xa   :  { %69 = shalt.err (!%p66_p4)
}
   0xb   :  { %21 = dma.hbm_to_vmem [thread:$0]  %s121_s1, 256, %s19_s10, [#allocation4]  }
   0xc   :  { %90 = dma.done.wait [#allocation4], 256  }
   0xd   :  { %91 = vsyncadd [#allocation4], 4294967040  ;;  %v28_v0 = vstv %s120_s0  ;;  %s95_s16 = smov [#allocation6]   ;;  %v26_v1 = vld [vmem:[#allocation3] sm:$0xff]  ;;  %v27_v2 = vld [vmem:[#allocation3 + $0x8] sm:$0xff] }
   0xe   :  { %s39_s17 = sshll.u32 %s95_s16, 4  ;;  %v29_v3 = vmul.f32 %v28_v0, %v26_v1  ;;  %v30_v4 = vmul.f32 %v28_v0, %v27_v2  ;;  %s40_s17 = int_to_ptr.vmem [resolvable:$true] %s39_s17 }
   0xf   :  { %s70_s18 = scalar_lea.vmem %s40_s17, 256  ;;  %p75_p6 = scmp.lt.s32.totalorder %s40_s17, %s40_s17 }
  0x10   :  { %31 = vst [vmem:[#allocation6] sm:$0xff] %v29_v3  ;;  %32 = vst [vmem:[#allocation6 + $0x8] sm:$0xff] %v30_v4  ;;  %p71_p5 = scmp.ne.s32.totalorder %s40_s17, %s70_s18  ;;  %p76_p7 = scmp.lt.s32.totalorder %s70_s18, %s70_s18 }
  0x12   :  { %p77_p8 = por %p76_p7, %p75_p6 }
  0x14   :  { %p78_p9 = pnand %p77_p8, %p71_p5 }
  0x16   :  { %81 = shalt.err (!%p78_p9)
}
  0x17   :  { %42 = dma.vmem_to_hbm [thread:$0]  %s40_s17, 256, %s122_s2, [#allocation5]  }
  0x18   :  { %92 = dma.done.wait [#allocation5], 256  }
  0x19   :  { %93 = vsyncadd [#allocation5], 4294967040 }
  0x1a   :  { %46 = vsyncpa [#allocation4], 1 }
  0x1b   :  { %47 = vsyncpa [#allocation5], 1 }

</bundles_post_ra>
